<compile_context>
chip_gen: v7x
topology: tpu7x:2x2x1
jax: 0.10.0
libtpu: 0.0.40
codegen_flags: <defaults>
</compile_context>

<pallas_src>
import functools

import jax
import jax.numpy as jnp
from jax.experimental import pallas as pl
from jax.experimental.pallas import tpu as pltpu

OUT_PAD = 128    # lane-dense padded action width (multiple of 128)
NEG_PAD = -1e30  # finite "minus infinity": exp underflows to exactly 0 while
                 # log-probs stay finite -> no NaN in the KL epilogue


def hybrid_agent_kernel(x_ref, w1_ref, b1_ref, w2_ref, b2_ref, out_ref, kl_ref):
    # x_ref : [B, D]     bf16
    # w1_ref: [D, 2H]    bf16  (logical | neural first layers)
    # b1_ref: [1, 2H]    f32
    # w2_ref: [2H, 128]  bf16  (rows 0:H = w2l, H:2H = w2n; lanes A:128 zero)
    # b2_ref: [2B, 128]  f32   (rows 0:B = b2l, B:2B = b2n; lanes A:128 = NEG_PAD)
    # out_ref:[2B, 128]  f32   (rows 0:B logical probs, B:2B neural probs)
    # kl_ref: [1, 1]     f32   KL(logical || neural), batchmean
    B = x_ref.shape[0]
    H = w1_ref.shape[1] // 2

    # ---- fused first layer: one MXU pass for both actors, f32 accumulate ----
    h = jnp.dot(x_ref[...], w1_ref[...],
                preferred_element_type=jnp.float32) + b1_ref[...]          # [B, 2H]

    # relu (logical, lanes 0:H) / tanh (neural, lanes H:2H) via lane-iota mask,
    # then sublane-stack to [2B, 2H] with the "wrong" half zeroed per row group.
    lane = jax.lax.broadcasted_iota(jnp.int32, h.shape, 1)
    is_logical = lane < H
    act = jnp.where(is_logical, jnp.maximum(h, 0.0), jnp.tanh(h))
    h_log = jnp.where(is_logical, act, 0.0)
    h_neu = jnp.where(is_logical, 0.0, act)
    h_stacked = jnp.concatenate([h_log, h_neu], axis=0).astype(jnp.bfloat16)  # [2B, 2H]

    # ---- fused second layer: one MXU pass -> sublane-stacked logits ----
    logits = jnp.dot(h_stacked, w2_ref[...],
                     preferred_element_type=jnp.float32) + b2_ref[...]     # [2B, 128]

    # ---- single softmax pass for both actors (padding lanes -> exact zeros) ----
    m = jnp.max(logits, axis=-1, keepdims=True)
    e = jnp.exp(logits - m)
    denom = jnp.sum(e, axis=-1, keepdims=True)
    probs = e / denom                                                       # [2B, 128]
    out_ref[...] = probs.astype(out_ref.dtype)  # one unmasked lane-dense store

    # ---- fused KL(logical || neural), batchmean, via log-softmax ----
    logp = (logits - m) - jnp.log(denom)                                    # [2B, 128]
    p = probs[:B, :]     # logical probs     (sublane-aligned slice)
    lp = logp[:B, :]     # logical log-probs
    lq = logp[B:, :]     # neural  log-probs
    per_row = jnp.sum(p * (lp - lq), axis=-1, keepdims=True)                # [B, 1]
    kl = jnp.sum(per_row, axis=0, keepdims=True) * (1.0 / B)                # [1, 1]
    kl_ref[...] = kl.astype(kl_ref.dtype)


def fuse_params(params, batch_size):
    """One-time fusion of both actors' params into MXU-ready kernel operands.

    Call once at init / whenever params update -- NOT per forward step.
    b2 is pre-broadcast to [2*batch_size, 128]; re-fuse if the batch changes.
    Returns (fused_dict, n_actions).
    """
    w1l, b1l, w2l, b2l = params["w1l"], params["b1l"], params["w2l"], params["b2l"]
    w1n, b1n, w2n, b2n = params["w1n"], params["b1n"], params["w2n"], params["b2n"]
    H = w1l.shape[1]
    A = w2l.shape[1]
    assert 2 * A <= OUT_PAD

    w1f = jnp.concatenate([w1l, w1n], axis=1).astype(jnp.bfloat16)          # [D, 2H]
    b1f = jnp.concatenate([b1l, b1n], axis=1).astype(jnp.float32)           # [1, 2H]

    w2s = jnp.zeros((2 * H, OUT_PAD), jnp.float32)
    w2s = w2s.at[:H, :A].set(w2l).at[H:, :A].set(w2n).astype(jnp.bfloat16)  # [2H, 128]

    row_l = jnp.full((1, OUT_PAD), NEG_PAD, jnp.float32).at[:, :A].set(b2l)
    row_n = jnp.full((1, OUT_PAD), NEG_PAD, jnp.float32).at[:, :A].set(b2n)
    b2s = jnp.concatenate(
        [jnp.broadcast_to(row_l, (batch_size, OUT_PAD)),
         jnp.broadcast_to(row_n, (batch_size, OUT_PAD))], axis=0)           # [2B, 128]

    return {"w1": w1f, "b1": b1f, "w2": w2s, "b2": b2s}, A


@functools.partial(jax.jit, static_argnames=("n_actions",))
def hybrid_agent_forward(x, fused, *, n_actions):
    """Returns (logical_dist [B,A], neural_dist [B,A], kl_div scalar)."""
    B = x.shape[0]
    assert fused["b2"].shape[0] == 2 * B, "re-run fuse_params for this batch size"

    x_bf = x.astype(jnp.bfloat16)
    full = lambda a: pl.BlockSpec(a.shape, lambda: (0,) * a.ndim)
    args = (x_bf, fused["w1"], fused["b1"], fused["w2"], fused["b2"])

    out, kl = pl.pallas_call(
        hybrid_agent_kernel,
        out_shape=(
            jax.ShapeDtypeStruct((2 * B, OUT_PAD), jnp.float32),
            jax.ShapeDtypeStruct((1, 1), jnp.float32),
        ),
        grid=(),
        in_specs=[full(a) for a in args],
        out_specs=(
            pl.BlockSpec((2 * B, OUT_PAD), lambda: (0, 0)),
            pl.BlockSpec((1, 1), lambda: (0, 0)),
        ),
        compiler_params=pltpu.CompilerParams(vmem_limit_bytes=32 * 1024 * 1024),
    )(*args)

    logical_dist = out[:B, :n_actions]
    neural_dist = out[B:, :n_actions]
    return logical_dist, neural_dist, kl[0, 0]


def init_params(key, d_state, d_hidden, n_actions):
    ks = jax.random.split(key, 8)
    s1 = 1.0 / jnp.sqrt(d_state)
    s2 = 1.0 / jnp.sqrt(d_hidden)
    return {
        "w1l": jax.random.normal(ks[0], (d_state, d_hidden), jnp.float32) * s1,
        "b1l": jax.random.normal(ks[1], (1, d_hidden), jnp.float32) * 0.01,
        "w2l": jax.random.normal(ks[2], (d_hidden, n_actions), jnp.float32) * s2,
        "b2l": jax.random.normal(ks[3], (1, n_actions), jnp.float32) * 0.01,
        "w1n": jax.random.normal(ks[4], (d_state, d_hidden), jnp.float32) * s1,
        "b1n": jax.random.normal(ks[5], (1, d_hidden), jnp.float32) * 0.01,
        "w2n": jax.random.normal(ks[6], (d_hidden, n_actions), jnp.float32) * s2,
        "b2n": jax.random.normal(ks[7], (1, n_actions), jnp.float32) * 0.01,
    }


if __name__ == "__main__":
    B, D, H, A = 8, 32, 32, 8  # batch, state dim, hidden dim, num actions
    KL_COEF = 0.5
    key = jax.random.PRNGKey(0)
    kx, kp = jax.random.split(key)
    x = jax.random.normal(kx, (B, D), jnp.float32)
    params = init_params(kp, D, H, A)

    # Hoisted out of the per-call path: fuse once, reuse across steps.
    fused, n_actions = fuse_params(params, B)

    logical_dist, neural_dist, kl_div = hybrid_agent_forward(
        x, fused, n_actions=n_actions)
    jax.block_until_ready((logical_dist, neural_dist, kl_div))

    # Plain-JAX reference mirroring the kernel's bf16 matmul operands.
    def ref(x, p):
        to = lambda a: a.astype(jnp.bfloat16).astype(jnp.float32)
        xb = to(x)
        hl = jnp.maximum(xb @ to(p["w1l"]) + p["b1l"], 0.0)
        hn = jnp.tanh(xb @ to(p["w1n"]) + p["b1n"])
        ll = to(hl) @ to(p["w2l"]) + p["b2l"]
        ln = to(hn) @ to(p["w2n"]) + p["b2n"]
        dl = jax.nn.softmax(ll, axis=-1)
        dn = jax.nn.softmax(ln, axis=-1)
        # eps-based KL exactly as in the PyTorch compute_kl_divergence
        eps = 1e-8
        pp = dl + eps
        qq = dn + eps
        pp = pp / jnp.sum(pp, axis=-1, keepdims=True)
        qq = qq / jnp.sum(qq, axis=-1, keepdims=True)
        kl = jnp.sum(pp * (jnp.log(pp) - jnp.log(qq))) / pp.shape[0]
        return dl, dn, kl

    rl, rn, rkl = ref(x, params)
    assert logical_dist.shape == (B, A) and neural_dist.shape == (B, A)
    assert jnp.allclose(logical_dist, rl, atol=2e-3), "logical dist mismatch"
    assert jnp.allclose(neural_dist, rn, atol=2e-3), "neural dist mismatch"
    assert jnp.allclose(jnp.sum(logical_dist, -1), 1.0, atol=2e-3)
    assert jnp.allclose(jnp.sum(neural_dist, -1), 1.0, atol=2e-3)
    assert jnp.allclose(kl_div, rkl, atol=2e-3), "KL mismatch"
    assert bool(jnp.isfinite(kl_div))

    # Weighted KL loss as in get_action_and_value_with_kl (kl_coef = 0.5).
    kl_loss = KL_COEF * kl_div
    jax.block_until_ready(kl_loss)

    print("KERNEL_OK")
</pallas_src>

<mosaic_0001>
module attributes {stable_mosaic.version = 11 : i64} {
  func.func @hybrid_agent_kernel(%arg0: memref<8x32xbf16, #tpu.memory_space<vmem>>, %arg1: memref<32x64xbf16, #tpu.memory_space<vmem>>, %arg2: memref<1x64xf32, #tpu.memory_space<vmem>>, %arg3: memref<64x128xbf16, #tpu.memory_space<vmem>>, %arg4: memref<16x128xf32, #tpu.memory_space<vmem>>, %arg5: memref<16x128xf32, #tpu.memory_space<vmem>>, %arg6: memref<1x1xf32, #tpu.memory_space<vmem>>) attributes {dimension_semantics = [], scalar_prefetch = 0 : i64, scratch_operands = 0 : i64, tpu.core_type = #tpu.core_type<tc>} {
    %c0 = arith.constant 0 : index
    %c0_0 = arith.constant 0 : index
    %0 = vector.load %arg0[%c0, %c0_0] : memref<8x32xbf16, #tpu.memory_space<vmem>>, vector<8x32xbf16>
    %c0_1 = arith.constant 0 : index
    %c0_2 = arith.constant 0 : index
    %1 = vector.load %arg1[%c0_1, %c0_2] : memref<32x64xbf16, #tpu.memory_space<vmem>>, vector<32x64xbf16>
    %cst = arith.constant dense<0.000000e+00> : vector<8x64xf32>
    %2 = tpu.matmul %0, %1, %cst {dimension_numbers = #tpu.dot_dimension_numbers<[1], [0], [0], [1], [0, 0, 1, 1], [], []>} : vector<8x32xbf16>, vector<32x64xbf16>, vector<8x64xf32> -> vector<8x64xf32>
    %c0_3 = arith.constant 0 : index
    %c0_4 = arith.constant 0 : index
    %3 = vector.load %arg2[%c0_3, %c0_4] : memref<1x64xf32, #tpu.memory_space<vmem>>, vector<1x64xf32>
    %4 = vector.broadcast %3 : vector<1x64xf32> to vector<8x64xf32>
    %5 = arith.addf %2, %4 : vector<8x64xf32>
    %6 = tpu.iota {dimensions = array<i32: 1>} : vector<8x64xi32>
    %c32_i32 = arith.constant 32 : i32
    %7 = vector.broadcast %c32_i32 : i32 to vector<8x64xi32>
    %8 = arith.cmpi slt, %6, %7 : vector<8x64xi32>
    %cst_5 = arith.constant 0.000000e+00 : f32
    %9 = vector.broadcast %cst_5 : f32 to vector<8x64xf32>
    %10 = arith.maximumf %5, %9 : vector<8x64xf32>
    %11 = math.tanh %5 : vector<8x64xf32>
    %12 = arith.select %8, %10, %11 : vector<8x64xi1>, vector<8x64xf32>
    %cst_6 = arith.constant 0.000000e+00 : f32
    %13 = vector.broadcast %cst_6 : f32 to vector<8x64xf32>
    %14 = arith.select %8, %12, %13 : vector<8x64xi1>, vector<8x64xf32>
    %cst_7 = arith.constant 0.000000e+00 : f32
    %15 = vector.broadcast %cst_7 : f32 to vector<8x64xf32>
    %16 = arith.select %8, %15, %12 : vector<8x64xi1>, vector<8x64xf32>
    %17 = tpu.concatenate %14, %16 in 0 : vector<8x64xf32>, vector<8x64xf32> -> vector<16x64xf32>
    %18 = arith.truncf %17 : vector<16x64xf32> to vector<16x64xbf16>
    %c0_8 = arith.constant 0 : index
    %c0_9 = arith.constant 0 : index
    %19 = vector.load %arg3[%c0_8, %c0_9] : memref<64x128xbf16, #tpu.memory_space<vmem>>, vector<64x128xbf16>
    %cst_10 = arith.constant dense<0.000000e+00> : vector<16x128xf32>
    %20 = tpu.matmul %18, %19, %cst_10 {dimension_numbers = #tpu.dot_dimension_numbers<[1], [0], [0], [1], [0, 0, 1, 1], [], []>} : vector<16x64xbf16>, vector<64x128xbf16>, vector<16x128xf32> -> vector<16x128xf32>
    %c0_11 = arith.constant 0 : index
    %c0_12 = arith.constant 0 : index
    %21 = vector.load %arg4[%c0_11, %c0_12] : memref<16x128xf32, #tpu.memory_space<vmem>>, vector<16x128xf32>
    %22 = arith.addf %20, %21 : vector<16x128xf32>
    %cst_13 = arith.constant dense<0xFF800000> : vector<16xf32>
    %23 = vector.multi_reduction <maximumf>, %22, %cst_13 [1] : vector<16x128xf32> to vector<16xf32>
    %24 = vector.shape_cast %23 : vector<16xf32> to vector<16x1xf32>
    %25 = vector.broadcast %24 : vector<16x1xf32> to vector<16x128xf32>
    %26 = arith.subf %22, %25 : vector<16x128xf32>
    %27 = math.exp %26 : vector<16x128xf32>
    %cst_14 = arith.constant dense<0.000000e+00> : vector<16xf32>
    %28 = vector.multi_reduction <add>, %27, %cst_14 [1] : vector<16x128xf32> to vector<16xf32>
    %29 = vector.shape_cast %28 : vector<16xf32> to vector<16x1xf32>
    %30 = vector.broadcast %29 : vector<16x1xf32> to vector<16x128xf32>
    %31 = arith.divf %27, %30 : vector<16x128xf32>
    %c0_15 = arith.constant 0 : index
    %c0_16 = arith.constant 0 : index
    %32 = vector.load %arg5[%c0_15, %c0_16] : memref<16x128xf32, #tpu.memory_space<vmem>>, vector<16x128xf32>
    tpu.vector_store %arg5[%c0_15, %c0_16], %31 {strides = array<i32>} : memref<16x128xf32, #tpu.memory_space<vmem>>, vector<16x128xf32>,
    %33 = vector.broadcast %24 : vector<16x1xf32> to vector<16x128xf32>
    %34 = arith.subf %22, %33 : vector<16x128xf32>
    %35 = math.log %29 : vector<16x1xf32>
    %36 = vector.broadcast %35 : vector<16x1xf32> to vector<16x128xf32>
    %37 = arith.subf %34, %36 : vector<16x128xf32>
    %38 = vector.extract_strided_slice %31 {offsets = [0, 0], sizes = [8, 128], strides = [1, 1]} : vector<16x128xf32> to vector<8x128xf32>
    %39 = vector.extract_strided_slice %37 {offsets = [0, 0], sizes = [8, 128], strides = [1, 1]} : vector<16x128xf32> to vector<8x128xf32>
    %40 = vector.extract_strided_slice %37 {offsets = [8, 0], sizes = [8, 128], strides = [1, 1]} : vector<16x128xf32> to vector<8x128xf32>
    %41 = arith.subf %39, %40 : vector<8x128xf32>
    %42 = arith.mulf %38, %41 : vector<8x128xf32>
    %cst_17 = arith.constant dense<0.000000e+00> : vector<8xf32>
    %43 = vector.multi_reduction <add>, %42, %cst_17 [1] : vector<8x128xf32> to vector<8xf32>
    %44 = vector.shape_cast %43 : vector<8xf32> to vector<8x1xf32>
    %cst_18 = arith.constant dense<0.000000e+00> : vector<1xf32>
    %45 = vector.multi_reduction <add>, %44, %cst_18 [0] : vector<8x1xf32> to vector<1xf32>
    %46 = vector.shape_cast %45 : vector<1xf32> to vector<1x1xf32>
    %cst_19 = arith.constant 1.250000e-01 : f32
    %47 = vector.broadcast %cst_19 : f32 to vector<1x1xf32>
    %48 = arith.mulf %46, %47 : vector<1x1xf32>
    %c0_20 = arith.constant 0 : index
    %c0_21 = arith.constant 0 : index
    %49 = vector.load %arg6[%c0_20, %c0_21] : memref<1x1xf32, #tpu.memory_space<vmem>>, vector<1x1xf32>
    tpu.vector_store %arg6[%c0_20, %c0_21], %48 {strides = array<i32>} : memref<1x1xf32, #tpu.memory_space<vmem>>, vector<1x1xf32>,
    return
  }
}

</mosaic_0001>

<bundles_post_ra>
// kernel: hybrid_agent_forward.1
= control target key start
LH: loop header
LB: loop body
LE: loop exit
PB: predicated region body
PF: predicated region fallthrough
CT: control target
= control target key end

     0   :  { %12 = vsyncpa [#allocation3], 0  ;;  %s502_s0 = inlined_call_operand.vmem [shape: bf16[8,32], index: 0, kind: input, shape index: {}]   ;;  %s503_s1 = inlined_call_operand.vmem [shape: bf16[32,64], index: 1, kind: input, shape index: {}]   ;;  %s504_s2 = inlined_call_operand.vmem [shape: f32[1,64], index: 2, kind: input, shape index: {}]   ;;  %s505_s3 = inlined_call_operand.hbm [shape: bf16[64,128], index: 3, kind: input, shape index: {}]   ;;  %s506_s4 = inlined_call_operand.hbm [shape: f32[16,128], index: 4, kind: input, shape index: {}]   ;;  %s507_s5 = inlined_call_operand.vmem [shape: f32[16,128], index: 5, kind: output, shape index: {0}]   ;;  %s508_s6 = inlined_call_operand.hbm [shape: f32[1,1], index: 6, kind: output, shape index: {1}]  }
   0x1   :  { %13 = vsyncpa [#allocation6], 0 }
   0x2   :  { %14 = vsyncpa [#allocation4], 0  ;;  %s404_s21 = smov [#allocation2]   ;;  %s332_s25 = scalar_lea.hbm %s505_s3, 512 }
   0x3   :  { %s26_s22 = sshll.u32 %s404_s21, 4  ;;  %p333_p0 = scmp.ne.s32.totalorder %s505_s3, %s332_s25  ;;  %s27_s22 = int_to_ptr.vmem [resolvable:$true] %s26_s22 }
   0x4   :  { %p336_p1 = scmp.lt.u32.totalorder %s332_s25, %s505_s3 }
   0x6   :  { %p338_p2 = pnand %p336_p1, %p333_p0 }
   0x8   :  { %341 = shalt.err (!%p338_p2)
}
   0x9   :  { %s342_s30 = scalar_lea.vmem %s27_s22, 512  ;;  %p347_p4 = scmp.lt.s32.totalorder %s27_s22, %s27_s22 }
   0xa   :  { %p343_p3 = scmp.ne.s32.totalorder %s27_s22, %s342_s30  ;;  %p348_p5 = scmp.lt.s32.totalorder %s342_s30, %s342_s30 }
   0xc   :  { %p349_p6 = por %p348_p5, %p347_p4 }
   0xe   :  { %p350_p7 = pnand %p349_p6, %p343_p3 }
  0x10   :  { %353 = shalt.err (!%p350_p7)
}
  0x11   :  { %s405_s7 = smov 64   ;;  %s406_s8 = smov 4  }
  0x12   :  { %32 = dma.hbm_to_vmem [thread:$0]  %s505_s3, 512, %s27_s22, [#allocation3], %s405_s7, %s405_s7, %s406_s8  }
  0x13   :  { %s407_s11 = smov [#allocation5]   ;;  %s354_s15 = scalar_lea.hbm %s506_s4, 256 }
  0x14   :  { %s38_s12 = sshll.u32 %s407_s11, 4  ;;  %p355_p8 = scmp.ne.s32.totalorder %s506_s4, %s354_s15  ;;  %s39_s12 = int_to_ptr.vmem [resolvable:$true] %s38_s12 }
  0x15   :  { %p358_p9 = scmp.lt.u32.totalorder %s354_s15, %s506_s4 }
  0x17   :  { %p360_p10 = pnand %p358_p9, %p355_p8 }
  0x19   :  { %363 = shalt.err (!%p360_p10)
}
  0x1a   :  { %s364_s20 = scalar_lea.vmem %s39_s12, 256  ;;  %p369_p12 = scmp.lt.s32.totalorder %s39_s12, %s39_s12 }
  0x1b   :  { %p365_p11 = scmp.ne.s32.totalorder %s39_s12, %s364_s20  ;;  %p370_p13 = scmp.lt.s32.totalorder %s364_s20, %s364_s20 }
  0x1d   :  { %p371_p0 = por %p370_p13, %p369_p12 }
  0x1f   :  { %p372_p1 = pnand %p371_p0, %p365_p11 }
  0x21   :  { %375 = shalt.err (!%p372_p1)
}
  0x22   :  { %s408_s3 = smov 128   ;;  %s409_s21 = smov 8  }
  0x23   :  { %44 = dma.hbm_to_vmem [thread:$0]  %s506_s4, 256, %s39_s12, [#allocation6], %s408_s3, %s408_s3, %s409_s21  }
  0x24   :  { %398 = dma.done.wait [#allocation3], 512  }
  0x25   :  { %399 = vsyncadd [#allocation3], 4294966784 }
  0x26   :  { %400 = dma.done.wait [#allocation6], 256  }
  0x27   :  { %401 = vsyncadd [#allocation6], 4294967040  ;;  %v410_v0 = vmov 0.0   ;;  %vm411_vm0 = vmmov 0   ;;  %v312_v1 = vld [vmem:[%s503_s1] sm:$0xff]   ;;  %v313_v2 = vld [vmem:[%s503_s1 + $0x8] sm:$0xff]   ;;  %v120_v13 = vlaneseq }
  0x28   :  { %283 = vmatprep.subr.bf16.mxu0 %v410_v0  ;;  %287 = vmatprep.mubr.msk.bf16.mxu0 %vm411_vm0, %v410_v0  ;;  %v52_v3 = vld [vmem:[%s502_s0] sm:$0xf]  ;;  %vm76_vm1 = vcmask 261120   ;;  %v315_v5 = vld [vmem:[#allocation2 + $0x8] sm:$0xff]   ;;  %v316_v6 = vld [vmem:[#allocation2 + $0x10] sm:$0xff]   ;;  %vm162_vm3 = vcmask 523264  }
  0x29   :  { %291 = vmatprep.subr.bf16.mxu1 %v410_v0  ;;  %299 = vmatprep.mubr.msk.bf16.mxu1 %vm411_vm0, %v410_v0  ;;  %v314_v4 = vld [vmem:[#allocation2] sm:$0xff]   ;;  %v317_v7 = vld [vmem:[#allocation2 + $0x18] sm:$0xff]   ;;  %v121_v15 = vand.u32 127, %v120_v13  ;;  %v137_v25 = vld [vmem:[#allocation5 + $0x8] sm:$0xff]  ;;  %s412_s8 = smov [#allocation7]   ;;  %vm244_vm4 = vcmask 0  }
  0x2a   :  { %284 = vmatpush3.bf16.msra.mxu0 %v312_v1  ;;  %292 = vmatpush3.bf16.msra.mxu1 %v314_v4  ;;  %v266_v8 = vld [vmem:[%s504_s2] ss:$0 sm:$0xff]  ;;  %s254_s9 = sshll.u32 %s412_s8, 4  ;;  %s255_s9 = int_to_ptr.vmem [resolvable:$true] %s254_s9 }
  0x2b   :  { %285 = vmatprep.subr.bf16.mxu0 %v410_v0  ;;  %293 = vmatprep.subr.bf16.mxu1 %v410_v0  ;;  %vm122_vm2 = vcmp.lt.s32.totalorder %v121_v15, 32  ;;  %v136_v21 = vld [vmem:[#allocation5] sm:$0xff]  ;;  %s376_s10 = scalar_lea.vmem %s255_s9, 16  ;;  %p381_p3 = scmp.lt.s32.totalorder %s255_s9, %s255_s9 }
  0x2c   :  { %p377_p2 = scmp.ne.s32.totalorder %s255_s9, %s376_s10 }
  0x2e   :  { %286 = vmatpush3.bf16.msra.mxu0 %v313_v2  ;;  %294 = vmatpush3.bf16.msra.mxu1 %v315_v5 }
  0x2f   :  { %295 = vmatprep.subr.bf16.mxu1 %v410_v0 }
  0x31   :  { %288 = vmatmul.mubr.msk.bf16.vlgmr.msra.gmra.mrb[0].mxu0 %vm76_vm1, %v52_v3 }
  0x32   :  { %296 = vmatpush3.bf16.msra.mxu1 %v316_v6 }
  0x33   :  { %297 = vmatprep.subr.bf16.mxu1 %v410_v0 }
  0x36   :  { %298 = vmatpush3.bf16.msra.mxu1 %v317_v7 }
 0x104   :  { %v114_v9 = vpop.f32.mrb[0].mxu0 }
 0x105   :  { %v115_v10 = vadd.f32 %v266_v8, %v114_v9  ;;  %v289_v11 = vpop.f32.mrb[1].mxu0 }
 0x106   :  { %v117_v12 = vpop.f32.mrb[2].mxu0 }
 0x107   :  { %318 = vtanh.f32 %v115_v10  ;;  %v290_v14 = vpop.f32.mrb[3].mxu0  ;;  %v123_v16 = vmax.f32 %v115_v10, 0.0 }
 0x109   :  { %v125_v18 = vsel %vm122_vm2, %v123_v16, 0.0 }
 0x111   :  { %v319_v17 = vpop.eup %318 }
 0x112   :  { %v126_v19 = vsel %vm122_vm2, 0.0, %v319_v17 }
 0x113   :  { %v127_v20 = vpack.c.bf16 %v126_v19, %v125_v18 }
 0x115   :  { %300 = vmatmul.mubr.msk.bf16.vlgmr.msra.gmra.mrb[0].mxu1 %vm162_vm3, %v127_v20 }
 0x1e8   :  { %v200_v22 = vpop.f32.mrb[0].mxu1 }
 0x1e9   :  { %v201_v23 = vadd.f32 %v200_v22, %v136_v21  ;;  %v301_v24 = vpop.f32.mrb[1].mxu1 }
 0x1ea   :  { %v203_v26 = vpop.f32.mrb[2].mxu1 }
 0x1eb   :  { %207 = vmax.xlane.f32.xlu0 %v201_v23  ;;  %v302_v27 = vpop.f32.mrb[3].mxu1  ;;  %v204_v28 = vadd.f32 %v203_v26, %v137_v25 }
 0x1ef   :  { %209 = vmax.xlane.f32.xlu0 %v204_v28 }
 0x278   :  { %v208_v29 = vpop.xlane.xlu0 %207 }
 0x279   :  { %v211_v30 = vsub.f32 %v201_v23, %v208_v29 }
 0x27b   :  { %v213_v31 = vmul.f32 1.442695, %v211_v30 }
 0x27c   :  { %v210_v32 = vpop.xlane.xlu0 %209 }
 0x27d   :  { %320 = vpow2.f32 %v213_v31  ;;  %v212_v33 = vsub.f32 %v204_v28, %v210_v32 }
 0x27f   :  { %v215_v34 = vmul.f32 1.442695, %v212_v33 }
 0x281   :  { %322 = vpow2.f32 %v215_v34 }
 0x287   :  { %v321_v35 = vpop.eup %320 }
 0x288   :  { %217 = vadd.xlane.f32.xlu1 %v321_v35 }
 0x28b   :  { %v323_v36 = vpop.eup %322 }
 0x28c   :  { %219 = vadd.xlane.f32.xlu1 %v323_v36 }
 0x315   :  { %v218_v37 = vpop.xlane.xlu1 %217 }
 0x316   :  { %324 = vrcp.f32 %v218_v37 }
 0x317   :  { %326 = vlog2.f32 %v218_v37 }
 0x319   :  { %v220_v38 = vpop.xlane.xlu1 %219 }
 0x31a   :  { %328 = vrcp.f32 %v220_v38 }
 0x31b   :  { %330 = vlog2.f32 %v220_v38 }
 0x320   :  { %v325_v39 = vpop.eup %324 }
 0x321   :  { %v327_v40 = vpop.eup %326  ;;  %v222_v41 = vmul.f32 %v325_v39, %v321_v35 }
 0x322   :  { %v228_v43 = vmul.f32 0.6931472, %v327_v40 }
 0x323   :  { %225 = vst [vmem:[%s507_s5] sm:$0xff] %v222_v41 }
 0x324   :  { %v329_v42 = vpop.eup %328  ;;  %v231_v48 = vsub.f32 %v211_v30, %v228_v43 }
 0x325   :  { %v331_v44 = vpop.eup %330  ;;  %v224_v45 = vmul.f32 %v329_v42, %v323_v36 }
 0x326   :  { %v230_v46 = vmul.f32 0.6931472, %v331_v44 }
 0x327   :  { %226 = vst [vmem:[%s507_s5 + $0x8] sm:$0xff] %v224_v45  ;;  %s380_s5 = scalar_lea.vmem %s255_s9, 32 }
 0x328   :  { %v232_v47 = vsub.f32 %v212_v33, %v230_v46  ;;  %p382_p4 = scmp.lt.s32.totalorder %s380_s5, %s376_s10 }
 0x32a   :  { %v233_v49 = vsub.f32 %v231_v48, %v232_v47  ;;  %p383_p5 = por %p382_p4, %p381_p3 }
 0x32c   :  { %v234_v50 = vmul.f32 %v233_v49, %v222_v41  ;;  %p384_p6 = pnand %p383_p5, %p377_p2 }
 0x32e   :  { %235 = vadd.xlane.f32.xlu0 %v234_v50 }
 0x3bb   :  { %v236_v51 = vpop.xlane.xlu0 %235 }
 0x3bc   :  { %v237_v52 = vrot.slane %v236_v51, 4 }
 0x3be   :  { %v238_v53 = vadd.f32 %v237_v52, %v236_v51 }
 0x3c0   :  { %v239_v54 = vrot.slane %v238_v53, 2 }
 0x3c2   :  { %v240_v55 = vadd.f32 %v239_v54, %v238_v53 }
 0x3c4   :  { %v241_v56 = vrot.slane %v240_v55, 1 }
 0x3c6   :  { %v242_v57 = vadd.f32 %v241_v56, %v240_v55 }
 0x3c8   :  { %v243_v58 = vmul.f32 0.125, %v242_v57 }
 0x3ca   :  { %245 = vst.msk [vmem:[#allocation7] sm:$0x1] %vm244_vm4, %v243_v58 }
 0x3cb   :  { %387 = shalt.err (!%p384_p6)
}
 0x3cc   :  { %s388_s13 = scalar_lea.hbm %s508_s6, 16 }
 0x3cd   :  { %p389_p7 = scmp.ne.s32.totalorder %s508_s6, %s388_s13  ;;  %p392_p8 = scmp.lt.u32.totalorder %s388_s13, %s508_s6 }
 0x3cf   :  { %p394_p9 = pnand %p392_p8, %p389_p7 }
 0x3d1   :  { %397 = shalt.err (!%p394_p9)
}
 0x3d2   :  { %257 = dma.vmem_to_hbm [thread:$0]  %s255_s9, 16, %s508_s6, [#allocation4]  }
 0x3d3   :  { %402 = dma.done.wait [#allocation4], 16  }
 0x3d4   :  { %403 = vsyncadd [#allocation4], 4294967280 }
 0x3d5   :  { %263 = vsyncpa [#allocation3], 1 }
 0x3d6   :  { %264 = vsyncpa [#allocation6], 1 }
 0x3d7   :  { %265 = vsyncpa [#allocation4], 1 }

</bundles_post_ra>
